<compile_context>
chip_gen: v7x
topology: tpu7x:2x2x1
jax: 0.10.0
libtpu: 0.0.40
codegen_flags: <defaults>
</compile_context>

<pallas_src>
import functools
import math

import jax
import jax.numpy as jnp
from jax.experimental import pallas as pl
from jax.experimental.pallas import tpu as pltpu

LANE = 128
_MIB = 1024 * 1024


def _round_up(n, m):
    return ((n + m - 1) // m) * m


def _vmem_caps():
    """(physical VMEM bytes, usable budget) with a safe fallback."""
    cap = 64 * _MIB
    try:
        info = pltpu.get_tpu_info()
        cap = int(getattr(info, "vmem_capacity_bytes", cap)) or cap
    except Exception:
        pass
    return cap, int(cap * 0.8)


def _limit(need, cap):
    """Right-sized vmem_limit_bytes: need + slack, clamped below physical."""
    return int(min(int(need * 1.25) + 4 * _MIB, int(cap * 0.9)))


# ----------------------------------------------------------------------------
# Fused multi-layer kernel (A fully resident): H <- relu(A @ (H @ W_i) + b_i)
# ----------------------------------------------------------------------------
def _fused_hypergcn_kernel(a_ref, x_ref, *rest, num_layers):
    # rest = (w_0, b_0, w_1, b_1, ..., out_ref)
    out_ref = rest[-1]

    a = a_ref[...]          # [Np, Np]   bf16 normalised Laplacian operator
    h = x_ref[...]          # [Np, F0p]  bf16 node features

    for i in range(num_layers):
        w = rest[2 * i][...]        # [Fi_p, Fo_p] bf16, already [in, out]
        b = rest[2 * i + 1][...]    # [1, Fo_p]    f32

        hw = jnp.dot(h, w, preferred_element_type=jnp.float32)          # MXU
        y = jnp.dot(a, hw.astype(a.dtype),
                    preferred_element_type=jnp.float32) + b             # MXU
        y = jnp.maximum(y, 0.0)     # relu after EVERY layer (incl. last)
        h = y.astype(x_ref.dtype)   # bf16 for next layer / writeback

    out_ref[...] = h                # bf16, lane-dense


# ----------------------------------------------------------------------------
# Tiled fallback (per layer, two calls):  HW = H @ W  then  Y = relu(A@HW + b)
# Row tiles of H / A are streamed by BlockSpec auto-pipelining; the grid axis
# is embarrassingly parallel ("parallel" -> both TCs on v7x).
# ----------------------------------------------------------------------------
def _hw_kernel(h_ref, w_ref, o_ref):
    o_ref[...] = jnp.dot(h_ref[...], w_ref[...],
                         preferred_element_type=jnp.float32).astype(o_ref.dtype)


def _ahw_relu_kernel(a_ref, hw_ref, b_ref, o_ref):
    y = jnp.dot(a_ref[...], hw_ref[...], preferred_element_type=jnp.float32)
    y = jnp.maximum(y + b_ref[...], 0.0)
    o_ref[...] = y.astype(o_ref.dtype)


# ----------------------------------------------------------------------------
# Wrapper: prepare (cache padded/cast operands) + forward
# ----------------------------------------------------------------------------
def prepare_hypergcn(a, params):
    """Pad + cast the fixed per-graph operator A and per-layer weights ONCE."""
    n = a.shape[0]
    n_p = _round_up(n, LANE)
    dims = [params[0][0].shape[0]] + [w.shape[1] for (w, _) in params]
    dims_p = [_round_up(d, LANE) for d in dims]

    def pad2(m, rows, cols):
        return jnp.pad(m, ((0, rows - m.shape[0]), (0, cols - m.shape[1])))

    a_p = pad2(a, n_p, n_p).astype(jnp.bfloat16)   # padded rows/cols exactly 0
    ws, bs = [], []
    for i, (w, b) in enumerate(params):
        ws.append(pad2(w, dims_p[i], dims_p[i + 1]).astype(jnp.bfloat16))
        bs.append(pad2(b.reshape(1, -1), 1, dims_p[i + 1]).astype(jnp.float32))

    return dict(a=a_p, ws=ws, bs=bs, n=n, n_p=n_p, c=dims[-1],
                dims_p=tuple(dims_p))


def _fused_vmem_bytes(n_p, dims_p):
    max_d = max(dims_p)
    a_b = n_p * n_p * 2
    x_b = n_p * dims_p[0] * 2
    w_b = sum(dims_p[i] * dims_p[i + 1] * 2 + dims_p[i + 1] * 4
              for i in range(len(dims_p) - 1))
    out_b = n_p * dims_p[-1] * 2
    inter_b = n_p * max_d * (4 + 4 + 2)   # hw(f32) + y(f32) + h(bf16)
    return a_b + x_b + w_b + out_b + inter_b


def _forward_fused(prep, x_p, need_bytes, cap):
    n_p, dims_p = prep["n_p"], prep["dims_p"]
    wb = []
    for w, b in zip(prep["ws"], prep["bs"]):
        wb.extend((w, b))
    args = (prep["a"], x_p, *wb)

    kernel = functools.partial(_fused_hypergcn_kernel, num_layers=len(prep["ws"]))
    full = lambda arr: pl.BlockSpec(arr.shape, lambda: (0,) * arr.ndim)

    return pl.pallas_call(
        kernel,
        out_shape=jax.ShapeDtypeStruct((n_p, dims_p[-1]), jnp.bfloat16),
        in_specs=[full(arr) for arr in args],
        out_specs=pl.BlockSpec((n_p, dims_p[-1]), lambda: (0, 0)),
        compiler_params=pltpu.CompilerParams(
            vmem_limit_bytes=_limit(need_bytes, cap)),
    )(*args)


def _pick_tile_rows(n_p, budget, max_tm=1024):
    # Double-buffered A row tile is 4 * tm * n_p bytes; keep it <= budget / 3.
    cap = max(LANE, (budget // (12 * n_p)) // LANE * LANE)
    cap = min(cap, max_tm, n_p)
    tm, q = LANE, n_p // LANE
    for d in range(1, q + 1):
        cand = d * LANE
        if q % d == 0 and cand <= cap:
            tm = cand
    return tm


def _layer_tiled(a_p, h, w, b, tm, cap):
    n_p = a_p.shape[0]
    fin, fout = w.shape
    grid = (n_p // tm,)
    par = ("parallel",)

    # Stage 1: HW = H @ W   (row-tiled over H, W resident)
    need_hw = 2 * (tm * fin * 2) + fin * fout * 2 + 2 * (tm * fout * 2) + tm * fout * 4
    hw = pl.pallas_call(
        _hw_kernel,
        out_shape=jax.ShapeDtypeStruct((n_p, fout), jnp.bfloat16),
        grid=grid,
        in_specs=[pl.BlockSpec((tm, fin), lambda i: (i, 0)),
                  pl.BlockSpec((fin, fout), lambda i: (0, 0))],
        out_specs=pl.BlockSpec((tm, fout), lambda i: (i, 0)),
        compiler_params=pltpu.CompilerParams(
            dimension_semantics=par, vmem_limit_bytes=_limit(need_hw, cap)),
    )(h, w)

    # Stage 2: Y = relu(A @ HW + b)   (A row tiles streamed, HW resident)
    need_y = (2 * (tm * n_p * 2) + n_p * fout * 2 + fout * 4
              + 2 * (tm * fout * 2) + tm * fout * 4)
    return pl.pallas_call(
        _ahw_relu_kernel,
        out_shape=jax.ShapeDtypeStruct((n_p, fout), jnp.bfloat16),
        grid=grid,
        in_specs=[pl.BlockSpec((tm, n_p), lambda i: (i, 0)),
                  pl.BlockSpec((n_p, fout), lambda i: (0, 0)),
                  pl.BlockSpec((1, fout), lambda i: (0, 0))],
        out_specs=pl.BlockSpec((tm, fout), lambda i: (i, 0)),
        compiler_params=pltpu.CompilerParams(
            dimension_semantics=par, vmem_limit_bytes=_limit(need_y, cap)),
    )(a_p, hw, b)


def _forward_tiled(prep, x_p, budget, cap, tile_rows=None):
    n_p = prep["n_p"]
    tm = tile_rows if tile_rows is not None else _pick_tile_rows(n_p, budget)
    assert n_p % tm == 0 and tm % 8 == 0, (n_p, tm)
    h = x_p
    for w, b in zip(prep["ws"], prep["bs"]):
        h = _layer_tiled(prep["a"], h, w, b, tm, cap)
    return h


def hypergcn_forward(prep, x, *, force_tiled=False, tile_rows=None):
    """Full L-layer HyperGCN forward on prepared (padded/cast) operands."""
    n, n_p, c, dims_p = prep["n"], prep["n_p"], prep["c"], prep["dims_p"]
    x_p = jnp.pad(x, ((0, n_p - x.shape[0]),
                      (0, dims_p[0] - x.shape[1]))).astype(jnp.bfloat16)

    cap, budget = _vmem_caps()
    need = _fused_vmem_bytes(n_p, dims_p)
    if (not force_tiled) and need <= budget:
        out_p = _forward_fused(prep, x_p, need, cap)          # A resident, 1 call
    else:
        out_p = _forward_tiled(prep, x_p, budget, cap, tile_rows)  # streamed A
    return out_p[:n, :c].astype(jnp.float32)


def hypergcn_pallas(a, x, params):
    """One-shot convenience wrapper (prepares per call; prefer prepare+forward)."""
    return hypergcn_forward(prepare_hypergcn(a, params), x)


# ----------------------------------------------------------------------------
# Pure-JAX f32 reference
# ----------------------------------------------------------------------------
def hypergcn_ref(a, x, params):
    h = x
    for (w, b) in params:
        h = jnp.maximum(a @ (h @ w) + b, 0.0)
    return h


if __name__ == "__main__":
    key = jax.random.PRNGKey(0)

    # Small synthetic hypergraph / model:
    #   num_features=32, num_layers=2, num_classes=4
    #   hidden dims h = [d] + [2**(l-i+2) for i in range(l-1)] + [c] = [32, 16, 4]
    N, E = 200, 64
    D, L, C = 32, 2, 4
    dims = [D] + [2 ** (L - i + 2) for i in range(L - 1)] + [C]

    k_x, k_h, k_p = jax.random.split(key, 3)
    x = jax.random.normal(k_x, (N, D), jnp.float32)

    # Random incidence matrix, no empty rows/cols.
    inc = (jax.random.uniform(k_h, (N, E)) < 0.1).astype(jnp.float32)
    inc = inc.at[jnp.arange(N), jnp.arange(N) % E].set(1.0)

    # Fixed normalised hypergraph operator (HyperGCN_fast / reapproximate=False):
    # clique-expansion adjacency + self-loops, symmetrically normalised.
    adj = inc @ inc.T
    adj = adj * (1.0 - jnp.eye(N))
    adj = (adj > 0).astype(jnp.float32) + jnp.eye(N)
    deg = jnp.sum(adj, axis=1)
    dinv = 1.0 / jnp.sqrt(deg)
    a = dinv[:, None] * adj * dinv[None, :]

    # Per-layer weights (HyperGraphConvolution: W [in, out], bias [out]).
    params = []
    for i in range(L):
        k_p, kw, kb = jax.random.split(k_p, 3)
        fan_in, fan_out = dims[i], dims[i + 1]
        bound = math.sqrt(6.0 / (fan_in + fan_out))
        w = jax.random.uniform(kw, (fan_in, fan_out), jnp.float32, -bound, bound)
        b = jax.random.uniform(kb, (fan_out,), jnp.float32, -bound, bound)
        params.append((w, b))

    ref = hypergcn_ref(a, x, params)

    # Pad/cast A + weights ONCE, reuse across forwards (feedback item 1).
    prep = prepare_hypergcn(a, params)

    # 1) Fused, fully-resident path (A fits VMEM at this size).
    out_fused = jax.block_until_ready(hypergcn_forward(prep, x))
    assert out_fused.shape == (N, C), out_fused.shape
    err_f = float(jnp.max(jnp.abs(out_fused - ref)))
    assert jnp.allclose(out_fused, ref, atol=5e-2, rtol=5e-2), \
        f"fused mismatch vs reference (max abs err {err_f})"

    # 2) Tiled / streamed fallback path (forced here to exercise grid > 1).
    out_tiled = jax.block_until_ready(
        hypergcn_forward(prep, x, force_tiled=True, tile_rows=128))
    assert out_tiled.shape == (N, C), out_tiled.shape
    err_t = float(jnp.max(jnp.abs(out_tiled - ref)))
    assert jnp.allclose(out_tiled, ref, atol=5e-2, rtol=5e-2), \
        f"tiled mismatch vs reference (max abs err {err_t})"

    print("KERNEL_OK")
</pallas_src>

<mosaic_0001>
module attributes {stable_mosaic.version = 11 : i64} {
  func.func @_fused_hypergcn_kernel(%arg0: memref<256x256xbf16, #tpu.memory_space<vmem>>, %arg1: memref<256x128xbf16, #tpu.memory_space<vmem>>, %arg2: memref<128x128xbf16, #tpu.memory_space<vmem>>, %arg3: memref<1x128xf32, #tpu.memory_space<vmem>>, %arg4: memref<128x128xbf16, #tpu.memory_space<vmem>>, %arg5: memref<1x128xf32, #tpu.memory_space<vmem>>, %arg6: memref<256x128xbf16, #tpu.memory_space<vmem>>) attributes {dimension_semantics = [], scalar_prefetch = 0 : i64, scratch_operands = 0 : i64, tpu.core_type = #tpu.core_type<tc>} {
    %c0 = arith.constant 0 : index
    %c0_0 = arith.constant 0 : index
    %0 = vector.load %arg0[%c0, %c0_0] : memref<256x256xbf16, #tpu.memory_space<vmem>>, vector<256x256xbf16>
    %c0_1 = arith.constant 0 : index
    %c0_2 = arith.constant 0 : index
    %1 = vector.load %arg1[%c0_1, %c0_2] : memref<256x128xbf16, #tpu.memory_space<vmem>>, vector<256x128xbf16>
    %c0_3 = arith.constant 0 : index
    %c0_4 = arith.constant 0 : index
    %2 = vector.load %arg2[%c0_3, %c0_4] : memref<128x128xbf16, #tpu.memory_space<vmem>>, vector<128x128xbf16>
    %c0_5 = arith.constant 0 : index
    %c0_6 = arith.constant 0 : index
    %3 = vector.load %arg3[%c0_5, %c0_6] : memref<1x128xf32, #tpu.memory_space<vmem>>, vector<1x128xf32>
    %cst = arith.constant dense<0.000000e+00> : vector<256x128xf32>
    %4 = tpu.matmul %1, %2, %cst {dimension_numbers = #tpu.dot_dimension_numbers<[1], [0], [0], [1], [0, 0, 1, 1], [], []>} : vector<256x128xbf16>, vector<128x128xbf16>, vector<256x128xf32> -> vector<256x128xf32>
    %5 = arith.truncf %4 : vector<256x128xf32> to vector<256x128xbf16>
    %cst_7 = arith.constant dense<0.000000e+00> : vector<256x128xf32>
    %6 = tpu.matmul %0, %5, %cst_7 {dimension_numbers = #tpu.dot_dimension_numbers<[1], [0], [0], [1], [0, 0, 1, 1], [], []>} : vector<256x256xbf16>, vector<256x128xbf16>, vector<256x128xf32> -> vector<256x128xf32>
    %7 = vector.broadcast %3 : vector<1x128xf32> to vector<256x128xf32>
    %8 = arith.addf %6, %7 : vector<256x128xf32>
    %cst_8 = arith.constant 0.000000e+00 : f32
    %9 = vector.broadcast %cst_8 : f32 to vector<256x128xf32>
    %10 = arith.maximumf %8, %9 : vector<256x128xf32>
    %11 = arith.truncf %10 : vector<256x128xf32> to vector<256x128xbf16>
    %c0_9 = arith.constant 0 : index
    %c0_10 = arith.constant 0 : index
    %12 = vector.load %arg4[%c0_9, %c0_10] : memref<128x128xbf16, #tpu.memory_space<vmem>>, vector<128x128xbf16>
    %c0_11 = arith.constant 0 : index
    %c0_12 = arith.constant 0 : index
    %13 = vector.load %arg5[%c0_11, %c0_12] : memref<1x128xf32, #tpu.memory_space<vmem>>, vector<1x128xf32>
    %cst_13 = arith.constant dense<0.000000e+00> : vector<256x128xf32>
    %14 = tpu.matmul %11, %12, %cst_13 {dimension_numbers = #tpu.dot_dimension_numbers<[1], [0], [0], [1], [0, 0, 1, 1], [], []>} : vector<256x128xbf16>, vector<128x128xbf16>, vector<256x128xf32> -> vector<256x128xf32>
    %15 = arith.truncf %14 : vector<256x128xf32> to vector<256x128xbf16>
    %cst_14 = arith.constant dense<0.000000e+00> : vector<256x128xf32>
    %16 = tpu.matmul %0, %15, %cst_14 {dimension_numbers = #tpu.dot_dimension_numbers<[1], [0], [0], [1], [0, 0, 1, 1], [], []>} : vector<256x256xbf16>, vector<256x128xbf16>, vector<256x128xf32> -> vector<256x128xf32>
    %17 = vector.broadcast %13 : vector<1x128xf32> to vector<256x128xf32>
    %18 = arith.addf %16, %17 : vector<256x128xf32>
    %cst_15 = arith.constant 0.000000e+00 : f32
    %19 = vector.broadcast %cst_15 : f32 to vector<256x128xf32>
    %20 = arith.maximumf %18, %19 : vector<256x128xf32>
    %21 = arith.truncf %20 : vector<256x128xf32> to vector<256x128xbf16>
    %c0_16 = arith.constant 0 : index
    %c0_17 = arith.constant 0 : index
    %22 = vector.load %arg6[%c0_16, %c0_17] : memref<256x128xbf16, #tpu.memory_space<vmem>>, vector<256x128xbf16>
    tpu.vector_store %arg6[%c0_16, %c0_17], %21 {strides = array<i32>} : memref<256x128xbf16, #tpu.memory_space<vmem>>, vector<256x128xbf16>,
    return
  }
}

</mosaic_0001>

<bundles_post_ra>
// kernel: tpu_custom_call.1
= control target key start
LH: loop header
LB: loop body
LE: loop exit
PB: predicated region body
PF: predicated region fallthrough
CT: control target
= control target key end

     0   :  { %11 = vsyncpa [#allocation3], 0  ;;  %s2602_s0 = inlined_call_operand.hbm [shape: bf16[256,256], index: 0, kind: input, shape index: {}]   ;;  %s2603_s1 = inlined_call_operand.hbm [shape: bf16[256,128], index: 1, kind: input, shape index: {}]   ;;  %s2604_s2 = inlined_call_operand.hbm [shape: bf16[128,128], index: 2, kind: input, shape index: {}]   ;;  %s2605_s3 = inlined_call_operand.vmem [shape: f32[1,128], index: 3, kind: input, shape index: {}]   ;;  %s2606_s4 = inlined_call_operand.hbm [shape: bf16[128,128], index: 4, kind: input, shape index: {}]   ;;  %s2607_s5 = inlined_call_operand.vmem [shape: f32[1,128], index: 5, kind: input, shape index: {}]   ;;  %s2608_s6 = inlined_call_operand.hbm [shape: bf16[256,128], index: 6, kind: output, shape index: {}]  }
   0x1   :  { %12 = vsyncpa [#allocation6], 0 }
   0x2   :  { %13 = vsyncpa [#allocation9], 0 }
   0x3   :  { %14 = vsyncpa [#allocation4], 0  ;;  %s2277_s21 = smov [#allocation5]   ;;  %s2159_s25 = scalar_lea.hbm %s2603_s1, 2048 }
   0x4   :  { %s32_s22 = sshll.u32 %s2277_s21, 4  ;;  %p2160_p0 = scmp.ne.s32.totalorder %s2603_s1, %s2159_s25  ;;  %s33_s22 = int_to_ptr.vmem [resolvable:$true] %s32_s22 }
   0x5   :  { %p2163_p1 = scmp.lt.u32.totalorder %s2159_s25, %s2603_s1 }
   0x7   :  { %p2165_p2 = pnand %p2163_p1, %p2160_p0 }
   0x9   :  { %2168 = shalt.err (!%p2165_p2)
}
   0xa   :  { %s2169_s30 = scalar_lea.vmem %s33_s22, 2048  ;;  %p2174_p4 = scmp.lt.s32.totalorder %s33_s22, %s33_s22 }
   0xb   :  { %p2170_p3 = scmp.ne.s32.totalorder %s33_s22, %s2169_s30  ;;  %p2175_p5 = scmp.lt.s32.totalorder %s2169_s30, %s2169_s30 }
   0xd   :  { %p2176_p6 = por %p2175_p5, %p2174_p4 }
   0xf   :  { %p2177_p7 = pnand %p2176_p6, %p2170_p3 }
  0x11   :  { %2180 = shalt.err (!%p2177_p7)
}
  0x12   :  { %s2278_s7 = smov 64   ;;  %s2279_s8 = smov 4  }
  0x13   :  { %38 = dma.hbm_to_vmem [thread:$0]  %s2603_s1, 2048, %s33_s22, [#allocation6], %s2278_s7, %s2278_s7, %s2279_s8  }
  0x14   :  { %s2280_s11 = smov [#allocation2]   ;;  %s2181_s15 = scalar_lea.hbm %s2602_s0, 4096 }
  0x15   :  { %s20_s12 = sshll.u32 %s2280_s11, 4  ;;  %p2182_p8 = scmp.ne.s32.totalorder %s2602_s0, %s2181_s15  ;;  %s21_s12 = int_to_ptr.vmem [resolvable:$true] %s20_s12 }
  0x16   :  { %p2185_p9 = scmp.lt.u32.totalorder %s2181_s15, %s2602_s0 }
  0x18   :  { %p2187_p10 = pnand %p2185_p9, %p2182_p8 }
  0x1a   :  { %2190 = shalt.err (!%p2187_p10)
}
  0x1b   :  { %s2191_s20 = scalar_lea.vmem %s21_s12, 4096  ;;  %p2196_p12 = scmp.lt.s32.totalorder %s21_s12, %s21_s12 }
  0x1c   :  { %p2192_p11 = scmp.ne.s32.totalorder %s21_s12, %s2191_s20  ;;  %p2197_p13 = scmp.lt.s32.totalorder %s2191_s20, %s2191_s20 }
  0x1e   :  { %p2198_p0 = por %p2197_p13, %p2196_p12 }
  0x20   :  { %p2199_p1 = pnand %p2198_p0, %p2192_p11 }
  0x22   :  { %2202 = shalt.err (!%p2199_p1)
}
  0x23   :  { %s2281_s1 = smov 128   ;;  %s2282_s21 = smov 8  }
  0x24   :  { %26 = dma.hbm_to_vmem [thread:$0]  %s2602_s0, 4096, %s21_s12, [#allocation3], %s2281_s1, %s2281_s1, %s2282_s21  }
  0x25   :  { %s2283_s24 = smov [#allocation7]   ;;  %s2284_s26 = smov [#allocation8]  }
  0x26   :  { %s44_s25 = sshll.u32 %s2283_s24, 4  ;;  %s58_s27 = sshll.u32 %s2284_s26, 4  ;;  %s45_s25 = int_to_ptr.vmem [resolvable:$true] %s44_s25  ;;  %s2348_s27 = int_to_ptr.vmem [resolvable:$true] %s58_s27 }
  0x27   :  { %s2203_s30 = scalar_lea.hbm %s2604_s2, 1024 }
  0x28   :  { %p2204_p2 = scmp.ne.s32.totalorder %s2604_s2, %s2203_s30  ;;  %p2207_p3 = scmp.lt.u32.totalorder %s2203_s30, %s2604_s2 }
  0x2a   :  { %p2209_p4 = pnand %p2207_p3, %p2204_p2 }
  0x2c   :  { %2212 = shalt.err (!%p2209_p4)
}
  0x2d   :  { %s2213_s0 = scalar_lea.vmem %s45_s25, 1024  ;;  %p2218_p6 = scmp.lt.s32.totalorder %s45_s25, %s45_s25 }
  0x2e   :  { %p2214_p5 = scmp.ne.s32.totalorder %s45_s25, %s2213_s0  ;;  %p2219_p7 = scmp.lt.s32.totalorder %s2213_s0, %s2213_s0 }
  0x30   :  { %p2220_p8 = por %p2219_p7, %p2218_p6 }
  0x32   :  { %p2221_p9 = pnand %p2220_p8, %p2214_p5 }
  0x34   :  { %2224 = shalt.err (!%p2221_p9)
}
  0x35   :  { %50 = dma.hbm_to_vmem [thread:$0]  %s2604_s2, 1024, %s45_s25, [#allocation6], %s2278_s7, %s2278_s7, %s2279_s8  }
  0x36   :  { %s2225_s17 = scalar_lea.hbm %s2606_s4, 1024 }
  0x37   :  { %p2226_p10 = scmp.ne.s32.totalorder %s2606_s4, %s2225_s17  ;;  %p2229_p11 = scmp.lt.u32.totalorder %s2225_s17, %s2606_s4 }
  0x39   :  { %p2231_p12 = pnand %p2229_p11, %p2226_p10 }
  0x3b   :  { %2234 = shalt.err (!%p2231_p12)
}
  0x3c   :  { %s2235_s21 = scalar_lea.vmem %s2348_s27, 1024  ;;  %p2240_p0 = scmp.lt.s32.totalorder %s2348_s27, %s2348_s27 }
  0x3d   :  { %p2236_p13 = scmp.ne.s32.totalorder %s2348_s27, %s2235_s21  ;;  %p2241_p1 = scmp.lt.s32.totalorder %s2235_s21, %s2235_s21 }
  0x3f   :  { %p2242_p2 = por %p2241_p1, %p2240_p0 }
  0x41   :  { %p2243_p3 = pnand %p2242_p2, %p2236_p13 }
  0x43   :  { %2246 = shalt.err (!%p2243_p3)
}
  0x44   :  { %64 = dma.hbm_to_vmem [thread:$0]  %s2606_s4, 1024, %s2348_s27, [#allocation9], %s2278_s7, %s2278_s7, %s2279_s8  }
  0x45   :  { %2269 = dma.done.wait [#allocation3], 4096  }
  0x46   :  { %2270 = vsyncadd [#allocation3], 4294963200 }
  0x47   :  { %2271 = dma.done.wait [#allocation6], 3072  }
  0x48   :  { %2272 = vsyncadd [#allocation6], 4294964224 }
  0x49   :  { %2273 = dma.done.wait [#allocation9], 1024  }
  0x4a   :  { %2274 = vsyncadd [#allocation9], 4294966272  ;;  %v2079_v0 = vld [vmem:[#allocation7] sm:$0xff]   ;;  %v2080_v1 = vld [vmem:[#allocation7 + $0x8] sm:$0xff]  }
  0x4b   :  { %1974 = vmatprep.subr.bf16.mxu1 %v2079_v0  ;;  %v2081_v2 = vld [vmem:[#allocation7 + $0x10] sm:$0xff]   ;;  %v2082_v3 = vld [vmem:[#allocation7 + $0x18] sm:$0xff]   ;;  %v2087_v4 = vld [vmem:[#allocation5] sm:$0xff]  }
  0x4c   :  { %1975 = vmatpush3.bf16.msra.mxu1 %v2079_v0  ;;  %1990 = vmatprep.mubr.bf16.mxu1 %v2087_v4  ;;  %v2083_v5 = vld [vmem:[#allocation7 + $0x20] sm:$0xff]   ;;  %v2084_v6 = vld [vmem:[#allocation7 + $0x28] sm:$0xff]   ;;  %v2085_v7 = vld [vmem:[#allocation7 + $0x30] sm:$0xff]  }
  0x4d   :  { %1976 = vmatprep.subr.bf16.mxu1 %v2080_v1  ;;  %v2086_v8 = vld [vmem:[#allocation7 + $0x38] sm:$0xff]   ;;  %v2088_v9 = vld [vmem:[#allocation5 + $0x8] sm:$0xff]   ;;  %v2089_v10 = vld [vmem:[#allocation5 + $0x10] sm:$0xff]  }
  0x4e   :  { %v2090_v11 = vld [vmem:[#allocation5 + $0x18] sm:$0xff]   ;;  %v2091_v12 = vld [vmem:[#allocation5 + $0x20] sm:$0xff]   ;;  %v2092_v13 = vld [vmem:[#allocation5 + $0x28] sm:$0xff]  }
  0x4f   :  { %v2093_v14 = vld [vmem:[#allocation5 + $0x30] sm:$0xff]   ;;  %v2094_v15 = vld [vmem:[#allocation5 + $0x38] sm:$0xff]   ;;  %v2095_v16 = vld [vmem:[#allocation5 + $0x40] sm:$0xff]  }
  0x50   :  { %1977 = vmatpush3.bf16.msra.mxu1 %v2080_v1  ;;  %v2096_v17 = vld [vmem:[#allocation5 + $0x48] sm:$0xff]   ;;  %v2097_v18 = vld [vmem:[#allocation5 + $0x50] sm:$0xff]   ;;  %v2098_v19 = vld [vmem:[#allocation5 + $0x58] sm:$0xff]  }
  0x51   :  { %1978 = vmatprep.subr.bf16.mxu1 %v2081_v2  ;;  %v2099_v20 = vld [vmem:[#allocation5 + $0x60] sm:$0xff]   ;;  %v2100_v21 = vld [vmem:[#allocation5 + $0x68] sm:$0xff]   ;;  %v2101_v22 = vld [vmem:[#allocation5 + $0x70] sm:$0xff]  }
  0x52   :  { %v2102_v23 = vld [vmem:[#allocation5 + $0x78] sm:$0xff]   ;;  %v2385_v24 = vld [vmem:[#allocation2 + $0x4] ss:$8 sps:$4 sm:$0xff]  }
  0x54   :  { %1979 = vmatpush3.bf16.msra.mxu1 %v2081_v2 }
  0x55   :  { %1980 = vmatprep.subr.bf16.mxu1 %v2082_v3 }
  0x58   :  { %1981 = vmatpush3.bf16.msra.mxu1 %v2082_v3 }
  0x59   :  { %1982 = vmatprep.subr.bf16.mxu1 %v2083_v5 }
  0x5c   :  { %1983 = vmatpush3.bf16.msra.mxu1 %v2083_v5 }
  0x5d   :  { %1984 = vmatprep.subr.bf16.mxu1 %v2084_v6 }
  0x60   :  { %1985 = vmatpush3.bf16.msra.mxu1 %v2084_v6 }
  0x61   :  { %1986 = vmatprep.subr.bf16.mxu1 %v2085_v7 }
  0x64   :  { %1987 = vmatpush3.bf16.msra.mxu1 %v2085_v7 }
  0x65   :  { %1988 = vmatprep.subr.bf16.mxu1 %v2086_v8 }
  0x68   :  { %1989 = vmatpush3.bf16.msra.mxu1 %v2086_v8 }
  0x6b   :  { %1991 = vmatmul.mubr.bf16.vlgmr.msra.gmra.mrb[0].mxu1 %v2088_v9  ;;  %v2151_v9 = vld [vmem:[#allocation8] sm:$0xff]  }
  0x6c   :  { %1994 = vmatprep.mubr.bf16.mxu1 %v2089_v10  ;;  %v2152_v10 = vld [vmem:[#allocation8 + $0x8] sm:$0xff]   ;;  %2022 = vmatprep.subr.bf16.mxu0 %v2151_v9 }
  0x6d   :  { %2023 = vmatpush3.bf16.msra.mxu0 %v2151_v9 }
  0x6e   :  { %2024 = vmatprep.subr.bf16.mxu0 %v2152_v10 }
  0x71   :  { %2025 = vmatpush3.bf16.msra.mxu0 %v2152_v10 }
  0x73   :  { %1995 = vmatmul.mubr.bf16.gmra.mrb[4].mxu1 %v2090_v11  ;;  %v2388_v11 = vld [vmem:[#allocation2] ss:$8 sps:$4 sm:$0xff]  }
  0x74   :  { %1998 = vmatprep.mubr.bf16.mxu1 %v2091_v12  ;;  %v2153_v12 = vld [vmem:[#allocation8 + $0x10] sm:$0xff]  }
  0x75   :  { %2026 = vmatprep.subr.bf16.mxu0 %v2153_v12 }
  0x76   :  { %2027 = vmatpush3.bf16.msra.mxu0 %v2153_v12 }
  0x7b   :  { %1999 = vmatmul.mubr.bf16.gmra.mrb[8].mxu1 %v2092_v13  ;;  %v2390_v13 = vld [vmem:[#allocation2 + $0x14] ss:$8 sps:$4 sm:$0xff]  }
  0x7c   :  { %2002 = vmatprep.mubr.bf16.mxu1 %v2093_v14  ;;  %v2154_v14 = vld [vmem:[#allocation8 + $0x18] sm:$0xff]  }
  0x7d   :  { %2028 = vmatprep.subr.bf16.mxu0 %v2154_v14 }
  0x7e   :  { %2029 = vmatpush3.bf16.msra.mxu0 %v2154_v14 }
  0x83   :  { %2003 = vmatmul.mubr.bf16.gmra.mrb[12].mxu1 %v2094_v15  ;;  %v2394_v15 = vld [vmem:[#allocation2 + $0x10] ss:$8 sps:$4 sm:$0xff]  }
  0x84   :  { %2006 = vmatprep.mubr.bf16.mxu1 %v2095_v16  ;;  %v2396_v16 = vld [vmem:[#allocation2 + $0x24] ss:$8 sps:$4 sm:$0xff]  }
  0x8b   :  { %2007 = vmatmul.mubr.bf16.gmra.mrb[16].mxu1 %v2096_v17  ;;  %v2400_v17 = vld [vmem:[#allocation2 + $0x20] ss:$8 sps:$4 sm:$0xff]  }
  0x8c   :  { %2010 = vmatprep.mubr.bf16.mxu1 %v2097_v18  ;;  %v2402_v18 = vld [vmem:[#allocation2 + $0x34] ss:$8 sps:$4 sm:$0xff]  }
  0x93   :  { %2011 = vmatmul.mubr.bf16.gmra.mrb[20].mxu1 %v2098_v19  ;;  %v2406_v19 = vld [vmem:[#allocation2 + $0x30] ss:$8 sps:$4 sm:$0xff]  }
  0x94   :  { %2014 = vmatprep.mubr.bf16.mxu1 %v2099_v20  ;;  %v2408_v20 = vld [vmem:[#allocation2 + $0x44] ss:$8 sps:$4 sm:$0xff]  }
  0x9b   :  { %2015 = vmatmul.mubr.bf16.gmra.mrb[24].mxu1 %v2100_v21  ;;  %v2412_v21 = vld [vmem:[#allocation2 + $0x40] ss:$8 sps:$4 sm:$0xff]  }
  0x9c   :  { %2018 = vmatprep.mubr.bf16.mxu1 %v2101_v22  ;;  %v2414_v22 = vld [vmem:[#allocation2 + $0x54] ss:$8 sps:$4 sm:$0xff]  }
  0xa3   :  { %2019 = vmatmul.mubr.bf16.gmra.mrb[28].mxu1 %v2102_v23  ;;  %v2418_v23 = vld [vmem:[#allocation2 + $0x50] ss:$8 sps:$4 sm:$0xff]  }
  0xa4   :  { %680 = vmatprep.mubr.bf16.mxu1 %v2385_v24 }
 0x13e   :  { %v1992_v25 = vpop.f32.mrb[0].mxu1 }
 0x13f   :  { %v339_v26 = vpop.f32.mrb[1].mxu1 }
 0x140   :  { %v1993_v27 = vpop.f32.mrb[2].mxu1 }
 0x141   :  { %v467_v28 = vpack.c.bf16 %v1993_v27, %v1992_v25  ;;  %v342_v29 = vpop.f32.mrb[3].mxu1  ;;  %v2420_v25 = vld [vmem:[#allocation2 + $0x64] ss:$8 sps:$4 sm:$0xff]   ;;  %v2426_v27 = vld [vmem:[#allocation2 + $0x74] ss:$8 sps:$4 sm:$0xff]  }
 0x142   :  { %v466_v30 = vpack.c.bf16 %v342_v29, %v339_v26  ;;  %v2424_v26 = vld [vmem:[#allocation2 + $0x60] ss:$8 sps:$4 sm:$0xff]   ;;  %v2432_v29 = vld [vmem:[#allocation2 + $0x84] ss:$8 sps:$4 sm:$0xff]  }
 0x146   :  { %v1996_v31 = vpop.f32.mrb[4].mxu1 }
 0x147   :  { %v355_v32 = vpop.f32.mrb[5].mxu1 }
 0x148   :  { %v1997_v33 = vpop.f32.mrb[6].mxu1 }
 0x149   :  { %v469_v34 = vpack.c.bf16 %v1997_v33, %v1996_v31  ;;  %v358_v35 = vpop.f32.mrb[7].mxu1  ;;  %v2438_v31 = vld [vmem:[#allocation2 + $0x94] ss:$8 sps:$4 sm:$0xff]   ;;  %v2444_v33 = vld [vmem:[#allocation2 + $0xa4] ss:$8 sps:$4 sm:$0xff]  }
 0x14a   :  { %v468_v36 = vpack.c.bf16 %v358_v35, %v355_v32  ;;  %v2442_v32 = vld [vmem:[#allocation2 + $0x90] ss:$8 sps:$4 sm:$0xff]   ;;  %v2450_v35 = vld [vmem:[#allocation2 + $0xb4] ss:$8 sps:$4 sm:$0xff]  }
 0x14e   :  { %v2000_v37 = vpop.f32.mrb[8].mxu1 }
 0x14f   :  { %v371_v38 = vpop.f32.mrb[9].mxu1 }
 0x150   :  { %v2001_v39 = vpop.f32.mrb[10].mxu1 }
 0x151   :  { %v471_v40 = vpack.c.bf16 %v2001_v39, %v2000_v37  ;;  %v374_v41 = vpop.f32.mrb[11].mxu1  ;;  %v2456_v37 = vld [vmem:[#allocation2 + $0xc4] ss:$8 sps:$4 sm:$0xff]  }
 0x152   :  { %v470_v42 = vpack.c.bf16 %v374_v41, %v371_v38  ;;  %v2155_v38 = vld [vmem:[#allocation8 + $0x20] sm:$0xff]   ;;  %v2156_v39 = vld [vmem:[#allocation8 + $0x28] sm:$0xff]   ;;  %v2462_v41 = vld [vmem:[#allocation2 + $0xd4] ss:$8 sps:$4 sm:$0xff]  }
 0x153   :  { %2030 = vmatprep.subr.bf16.mxu0 %v2155_v38 }
 0x154   :  { %2031 = vmatpush3.bf16.msra.mxu0 %v2155_v38 }
 0x155   :  { %2032 = vmatprep.subr.bf16.mxu0 %v2156_v39 }
 0x156   :  { %v2004_v43 = vpop.f32.mrb[12].mxu1 }
 0x157   :  { %v387_v44 = vpop.f32.mrb[13].mxu1 }
 0x158   :  { %v2005_v45 = vpop.f32.mrb[14].mxu1  ;;  %2033 = vmatpush3.bf16.msra.mxu0 %v2156_v39 }
 0x159   :  { %v473_v46 = vpack.c.bf16 %v2005_v45, %v2004_v43  ;;  %v390_v47 = vpop.f32.mrb[15].mxu1  ;;  %v2158_v43 = vld [vmem:[#allocation8 + $0x38] sm:$0xff]   ;;  %v2468_v45 = vld [vmem:[#allocation2 + $0xe4] ss:$8 sps:$4 sm:$0xff]  }
 0x15a   :  { %v472_v48 = vpack.c.bf16 %v390_v47, %v387_v44  ;;  %v2466_v44 = vld [vmem:[#allocation2 + $0xd0] ss:$8 sps:$4 sm:$0xff]   ;;  %v2474_v47 = vld [vmem:[#allocation2 + $0xf4] ss:$8 sps:$4 sm:$0xff]  }
 0x15e   :  { %v2008_v49 = vpop.f32.mrb[16].mxu1 }
 0x15f   :  { %v403_v50 = vpop.f32.mrb[17].mxu1 }
 0x160   :  { %v2009_v51 = vpop.f32.mrb[18].mxu1 }
 0x161   :  { %v475_v52 = vpack.c.bf16 %v2009_v51, %v2008_v49  ;;  %v406_v53 = vpop.f32.mrb[19].mxu1  ;;  %v2484_v51 = vld [vmem:[%s2605_s3] ss:$0 sm:$0xff] }
 0x162   :  { %v474_v54 = vpack.c.bf16 %v406_v53, %v403_v50 }
 0x164   :  { %1726 = vmatprep.subr.bf16.mxu1 %v474_v54 }
 0x165   :  { %1727 = vmatpush3.bf16.msra.mxu1 %v466_v30  ;;  %v2436_v30 = vld [vmem:[#allocation2 + $0x80] ss:$8 sps:$4 sm:$0xff]  }
 0x166   :  { %v2012_v55 = vpop.f32.mrb[20].mxu1  ;;  %1728 = vmatprep.subr.bf16.mxu1 %v475_v52 }
 0x167   :  { %v419_v56 = vpop.f32.mrb[21].mxu1 }
 0x168   :  { %v2013_v57 = vpop.f32.mrb[22].mxu1 }
 0x169   :  { %v477_v58 = vpack.c.bf16 %v2013_v57, %v2012_v55  ;;  %v422_v59 = vpop.f32.mrb[23].mxu1  ;;  %1729 = vmatpush3.bf16.msra.mxu1 %v467_v28  ;;  %v2430_v28 = vld [vmem:[#allocation2 + $0x70] ss:$8 sps:$4 sm:$0xff]  }
 0x16a   :  { %v476_v60 = vpack.c.bf16 %v422_v59, %v419_v56 }
 0x16c   :  { %1730 = vmatprep.subr.bf16.mxu1 %v476_v60 }
 0x16d   :  { %1731 = vmatpush3.bf16.msra.mxu1 %v468_v36  ;;  %v2454_v36 = vld [vmem:[#allocation2 + $0xb0] ss:$8 sps:$4 sm:$0xff]  }
 0x16e   :  { %v2016_v61 = vpop.f32.mrb[24].mxu1  ;;  %1732 = vmatprep.subr.bf16.mxu1 %v477_v58 }
 0x16f   :  { %v435_v62 = vpop.f32.mrb[25].mxu1 }
 0x170   :  { %v2017_v63 = vpop.f32.mrb[26].mxu1 }
 0x171   :  { %v479_v0 = vpack.c.bf16 %v2017_v63, %v2016_v61  ;;  %v438_v1 = vpop.f32.mrb[27].mxu1  ;;  %1733 = vmatpush3.bf16.msra.mxu1 %v469_v34  ;;  %v2448_v34 = vld [vmem:[#allocation2 + $0xa0] ss:$8 sps:$4 sm:$0xff]  }
 0x172   :  { %v478_v2 = vpack.c.bf16 %v438_v1, %v435_v62 }
 0x174   :  { %1734 = vmatprep.subr.bf16.mxu1 %v478_v2 }
 0x175   :  { %1735 = vmatpush3.bf16.msra.mxu1 %v470_v42  ;;  %v2157_v42 = vld [vmem:[#allocation8 + $0x30] sm:$0xff]  }
 0x176   :  { %v2020_v3 = vpop.f32.mrb[28].mxu1  ;;  %1736 = vmatprep.subr.bf16.mxu1 %v479_v0  ;;  %2034 = vmatprep.subr.bf16.mxu0 %v2157_v42 }
 0x177   :  { %v451_v4 = vpop.f32.mrb[29].mxu1  ;;  %2035 = vmatpush3.bf16.msra.mxu0 %v2157_v42 }
 0x178   :  { %v2021_v5 = vpop.f32.mrb[30].mxu1  ;;  %2036 = vmatprep.subr.bf16.mxu0 %v2158_v43 }
 0x179   :  { %v481_v6 = vpack.c.bf16 %v2021_v5, %v2020_v3  ;;  %v454_v7 = vpop.f32.mrb[31].mxu1  ;;  %1737 = vmatpush3.bf16.msra.mxu1 %v471_v40  ;;  %v2460_v40 = vld [vmem:[#allocation2 + $0xc0] ss:$8 sps:$4 sm:$0xff]  }
 0x17a   :  { %v480_v8 = vpack.c.bf16 %v454_v7, %v451_v4 }
 0x17b   :  { %2037 = vmatpush3.bf16.msra.mxu0 %v2158_v43 }
 0x17c   :  { %1738 = vmatprep.subr.bf16.mxu1 %v480_v8 }
 0x17d   :  { %1739 = vmatpush3.bf16.msra.mxu1 %v472_v48  ;;  %v2478_v48 = vld [vmem:[#allocation2 + $0xf0] ss:$8 sps:$4 sm:$0xff]  }
 0x17e   :  { %1740 = vmatprep.subr.bf16.mxu1 %v481_v6 }
 0x181   :  { %1741 = vmatpush3.bf16.msra.mxu1 %v473_v46  ;;  %v2472_v46 = vld [vmem:[#allocation2 + $0xe0] ss:$8 sps:$4 sm:$0xff]  }
 0x184   :  { %681 = vmatmul.mubr.bf16.vlgmr.msra.gmra.mrb[32].mxu1 %v2388_v11 }
 0x185   :  { %688 = vmatprep.mubr.bf16.mxu1 %v2390_v13 }
 0x18c   :  { %689 = vmatmul.mubr.bf16.gmra.mrb[36].mxu1 %v2394_v15 }
 0x18d   :  { %696 = vmatprep.mubr.bf16.mxu1 %v2396_v16 }
 0x194   :  { %697 = vmatmul.mubr.bf16.gmra.mrb[40].mxu1 %v2400_v17 }
 0x195   :  { %704 = vmatprep.mubr.bf16.mxu1 %v2402_v18 }
 0x19c   :  { %705 = vmatmul.mubr.bf16.gmra.mrb[44].mxu1 %v2406_v19 }
 0x19d   :  { %712 = vmatprep.mubr.bf16.mxu1 %v2408_v20 }
 0x1a4   :  { %713 = vmatmul.mubr.bf16.gmra.mrb[48].mxu1 %v2412_v21 }
 0x1a5   :  { %720 = vmatprep.mubr.bf16.mxu1 %v2414_v22 }
 0x1ac   :  { %721 = vmatmul.mubr.bf16.gmra.mrb[52].mxu1 %v2418_v23 }
 0x1ad   :  { %728 = vmatprep.mubr.bf16.mxu1 %v2420_v25 }
 0x1b4   :  { %729 = vmatmul.mubr.bf16.gmra.mrb[56].mxu1 %v2424_v26 }
 0x1b5   :  { %736 = vmatprep.mubr.bf16.mxu1 %v2426_v27 }
 0x1bc   :  { %737 = vmatmul.mubr.bf16.gmra.mrb[60].mxu1 %v2430_v28 }
 0x1bd   :  { %744 = vmatprep.mubr.bf16.mxu1 %v2432_v29 }
 0x1c4   :  { %745 = vmatmul.mubr.bf16.gmra.mrb[64].mxu1 %v2436_v30 }
 0x1c5   :  { %752 = vmatprep.mubr.bf16.mxu1 %v2438_v31 }
 0x1cc   :  { %753 = vmatmul.mubr.bf16.gmra.mrb[68].mxu1 %v2442_v32 }
 0x1cd   :  { %760 = vmatprep.mubr.bf16.mxu1 %v2444_v33 }
 0x1d4   :  { %761 = vmatmul.mubr.bf16.gmra.mrb[72].mxu1 %v2448_v34 }
 0x1d5   :  { %768 = vmatprep.mubr.bf16.mxu1 %v2450_v35 }
 0x1dc   :  { %769 = vmatmul.mubr.bf16.gmra.mrb[76].mxu1 %v2454_v36 }
 0x1dd   :  { %776 = vmatprep.mubr.bf16.mxu1 %v2456_v37 }
 0x1e4   :  { %777 = vmatmul.mubr.bf16.gmra.mrb[80].mxu1 %v2460_v40 }
 0x1e5   :  { %784 = vmatprep.mubr.bf16.mxu1 %v2462_v41 }
 0x1ec   :  { %785 = vmatmul.mubr.bf16.gmra.mrb[84].mxu1 %v2466_v44 }
 0x1ed   :  { %792 = vmatprep.mubr.bf16.mxu1 %v2468_v45 }
 0x1f4   :  { %793 = vmatmul.mubr.bf16.gmra.mrb[88].mxu1 %v2472_v46 }
 0x1f5   :  { %800 = vmatprep.mubr.bf16.mxu1 %v2474_v47 }
 0x1fc   :  { %801 = vmatmul.mubr.bf16.gmra.mrb[92].mxu1 %v2478_v48 }
 0x257   :  { %v1742_v49 = vpop.f32.mrb[32].mxu1 }
 0x258   :  { %v1743_v50 = vpop.f32.mrb[33].mxu1 }
 0x259   :  { %v1744_v52 = vadd.f32 %v1743_v50, %v1742_v49  ;;  %v1745_v53 = vpop.f32.mrb[34].mxu1 }
 0x25a   :  { %v1746_v54 = vpop.f32.mrb[35].mxu1 }
 0x25b   :  { %v1747_v55 = vadd.f32 %v1746_v54, %v1745_v53  ;;  %v683_v56 = vadd.f32 %v1744_v52, %v2484_v51 }
 0x25d   :  { %v686_v57 = vadd.f32 %v1747_v55, %v2484_v51  ;;  %v809_v59 = vmax.f32 %v683_v56, 0.0 }
 0x25f   :  { %v1748_v58 = vpop.f32.mrb[36].mxu1  ;;  %v810_v60 = vmax.f32 %v686_v57, 0.0 }
 0x260   :  { %v1749_v61 = vpop.f32.mrb[37].mxu1 }
 0x261   :  { %v1750_v62 = vadd.f32 %v1749_v61, %v1748_v58  ;;  %v1751_v63 = vpop.f32.mrb[38].mxu1  ;;  %v841_v0 = vpack.c.bf16 %v810_v60, %v809_v59 }
 0x262   :  { %v1752_v1 = vpop.f32.mrb[39].mxu1 }
 0x263   :  { %v691_v2 = vadd.f32 %v1750_v62, %v2484_v51  ;;  %v1753_v3 = vadd.f32 %v1752_v1, %v1751_v63  ;;  %2038 = vmatprep.mubr.bf16.mxu0 %v841_v0 }
 0x265   :  { %v694_v4 = vadd.f32 %v1753_v3, %v2484_v51  ;;  %v811_v5 = vmax.f32 %v691_v2, 0.0 }
 0x267   :  { %v812_v6 = vmax.f32 %v694_v4, 0.0  ;;  %v1754_v7 = vpop.f32.mrb[40].mxu1 }
 0x268   :  { %v1755_v8 = vpop.f32.mrb[41].mxu1 }
 0x269   :  { %v1756_v9 = vadd.f32 %v1755_v8, %v1754_v7  ;;  %v842_v10 = vpack.c.bf16 %v812_v6, %v811_v5  ;;  %v1757_v12 = vpop.f32.mrb[42].mxu1 }
 0x26a   :  { %v1758_v14 = vpop.f32.mrb[43].mxu1 }
 0x26b   :  { %v699_v38 = vadd.f32 %v1756_v9, %v2484_v51  ;;  %2039 = vmatmul.mubr.bf16.vlgmr.msra.gmra.mrb[0].mxu0 %v842_v10  ;;  %v1759_v39 = vadd.f32 %v1758_v14, %v1757_v12 }
 0x26d   :  { %v702_v42 = vadd.f32 %v1759_v39, %v2484_v51  ;;  %v813_v43 = vmax.f32 %v699_v38, 0.0 }
 0x26f   :  { %v814_v49 = vmax.f32 %v702_v42, 0.0  ;;  %v1760_v50 = vpop.f32.mrb[44].mxu1 }
 0x270   :  { %v1761_v52 = vpop.f32.mrb[45].mxu1 }
 0x271   :  { %v1762_v53 = vadd.f32 %v1761_v52, %v1760_v50  ;;  %v1763_v54 = vpop.f32.mrb[46].mxu1  ;;  %v843_v55 = vpack.c.bf16 %v814_v49, %v813_v43 }
 0x272   :  { %v1764_v56 = vpop.f32.mrb[47].mxu1 }
 0x273   :  { %v707_v57 = vadd.f32 %v1762_v53, %v2484_v51  ;;  %v1765_v58 = vadd.f32 %v1764_v56, %v1763_v54  ;;  %2042 = vmatprep.mubr.bf16.mxu0 %v843_v55 }
 0x275   :  { %v710_v59 = vadd.f32 %v1765_v58, %v2484_v51  ;;  %v815_v60 = vmax.f32 %v707_v57, 0.0 }
 0x277   :  { %v816_v61 = vmax.f32 %v710_v59, 0.0  ;;  %v1766_v62 = vpop.f32.mrb[48].mxu1 }
 0x278   :  { %v1767_v63 = vpop.f32.mrb[49].mxu1 }
 0x279   :  { %v1768_v0 = vadd.f32 %v1767_v63, %v1766_v62  ;;  %v1769_v1 = vpop.f32.mrb[50].mxu1  ;;  %v844_v2 = vpack.c.bf16 %v816_v61, %v815_v60 }
 0x27a   :  { %v1770_v3 = vpop.f32.mrb[51].mxu1 }
 0x27b   :  { %v715_v4 = vadd.f32 %v1768_v0, %v2484_v51  ;;  %2043 = vmatmul.mubr.bf16.gmra.mrb[4].mxu0 %v844_v2  ;;  %v1771_v5 = vadd.f32 %v1770_v3, %v1769_v1 }
 0x27d   :  { %v718_v6 = vadd.f32 %v1771_v5, %v2484_v51  ;;  %v817_v7 = vmax.f32 %v715_v4, 0.0 }
 0x27f   :  { %v818_v8 = vmax.f32 %v718_v6, 0.0  ;;  %v1772_v9 = vpop.f32.mrb[52].mxu1 }
 0x280   :  { %v1773_v10 = vpop.f32.mrb[53].mxu1 }
 0x281   :  { %v1774_v12 = vadd.f32 %v1773_v10, %v1772_v9  ;;  %v1775_v14 = vpop.f32.mrb[54].mxu1  ;;  %v845_v38 = vpack.c.bf16 %v818_v8, %v817_v7 }
 0x282   :  { %v1776_v39 = vpop.f32.mrb[55].mxu1 }
 0x283   :  { %v723_v42 = vadd.f32 %v1774_v12, %v2484_v51  ;;  %v1777_v43 = vadd.f32 %v1776_v39, %v1775_v14  ;;  %2046 = vmatprep.mubr.bf16.mxu0 %v845_v38 }
 0x285   :  { %v726_v49 = vadd.f32 %v1777_v43, %v2484_v51  ;;  %v819_v50 = vmax.f32 %v723_v42, 0.0 }
 0x287   :  { %v820_v52 = vmax.f32 %v726_v49, 0.0  ;;  %v1778_v53 = vpop.f32.mrb[56].mxu1 }
 0x288   :  { %v1779_v54 = vpop.f32.mrb[57].mxu1 }
 0x289   :  { %v1780_v55 = vadd.f32 %v1779_v54, %v1778_v53  ;;  %v1781_v56 = vpop.f32.mrb[58].mxu1  ;;  %v846_v57 = vpack.c.bf16 %v820_v52, %v819_v50 }
 0x28a   :  { %v1782_v58 = vpop.f32.mrb[59].mxu1 }
 0x28b   :  { %v731_v59 = vadd.f32 %v1780_v55, %v2484_v51  ;;  %v1783_v60 = vadd.f32 %v1782_v58, %v1781_v56  ;;  %2047 = vmatmul.mubr.bf16.gmra.mrb[8].mxu0 %v846_v57 }
 0x28d   :  { %v734_v61 = vadd.f32 %v1783_v60, %v2484_v51  ;;  %v821_v62 = vmax.f32 %v731_v59, 0.0 }
 0x28f   :  { %v822_v63 = vmax.f32 %v734_v61, 0.0  ;;  %v1784_v0 = vpop.f32.mrb[60].mxu1 }
 0x290   :  { %v1785_v1 = vpop.f32.mrb[61].mxu1 }
 0x291   :  { %v1786_v2 = vadd.f32 %v1785_v1, %v1784_v0  ;;  %v1787_v3 = vpop.f32.mrb[62].mxu1  ;;  %v847_v4 = vpack.c.bf16 %v822_v63, %v821_v62 }
 0x292   :  { %v1788_v5 = vpop.f32.mrb[63].mxu1 }
 0x293   :  { %v739_v6 = vadd.f32 %v1786_v2, %v2484_v51  ;;  %v1789_v7 = vadd.f32 %v1788_v5, %v1787_v3  ;;  %2050 = vmatprep.mubr.bf16.mxu0 %v847_v4 }
 0x295   :  { %v742_v8 = vadd.f32 %v1789_v7, %v2484_v51  ;;  %v823_v9 = vmax.f32 %v739_v6, 0.0 }
 0x297   :  { %v824_v10 = vmax.f32 %v742_v8, 0.0  ;;  %v1790_v12 = vpop.f32.mrb[64].mxu1 }
 0x298   :  { %v1791_v14 = vpop.f32.mrb[65].mxu1 }
 0x299   :  { %v1792_v38 = vadd.f32 %v1791_v14, %v1790_v12  ;;  %v1793_v39 = vpop.f32.mrb[66].mxu1  ;;  %v848_v42 = vpack.c.bf16 %v824_v10, %v823_v9 }
 0x29a   :  { %v1794_v43 = vpop.f32.mrb[67].mxu1 }
 0x29b   :  { %v747_v49 = vadd.f32 %v1792_v38, %v2484_v51  ;;  %v1795_v50 = vadd.f32 %v1794_v43, %v1793_v39  ;;  %2051 = vmatmul.mubr.bf16.gmra.mrb[12].mxu0 %v848_v42 }
 0x29d   :  { %v750_v52 = vadd.f32 %v1795_v50, %v2484_v51  ;;  %v825_v53 = vmax.f32 %v747_v49, 0.0 }
 0x29f   :  { %v826_v54 = vmax.f32 %v750_v52, 0.0  ;;  %v1796_v55 = vpop.f32.mrb[68].mxu1 }
 0x2a0   :  { %v1797_v56 = vpop.f32.mrb[69].mxu1 }
 0x2a1   :  { %v1798_v57 = vadd.f32 %v1797_v56, %v1796_v55  ;;  %v1799_v58 = vpop.f32.mrb[70].mxu1  ;;  %v849_v59 = vpack.c.bf16 %v826_v54, %v825_v53 }
 0x2a2   :  { %v1800_v60 = vpop.f32.mrb[71].mxu1 }
 0x2a3   :  { %v755_v61 = vadd.f32 %v1798_v57, %v2484_v51  ;;  %v1801_v62 = vadd.f32 %v1800_v60, %v1799_v58  ;;  %2054 = vmatprep.mubr.bf16.mxu0 %v849_v59 }
 0x2a5   :  { %v758_v63 = vadd.f32 %v1801_v62, %v2484_v51  ;;  %v827_v0 = vmax.f32 %v755_v61, 0.0 }
 0x2a7   :  { %v828_v1 = vmax.f32 %v758_v63, 0.0  ;;  %v1802_v2 = vpop.f32.mrb[72].mxu1 }
 0x2a8   :  { %v1803_v3 = vpop.f32.mrb[73].mxu1 }
 0x2a9   :  { %v850_v4 = vpack.c.bf16 %v828_v1, %v827_v0  ;;  %v1804_v5 = vadd.f32 %v1803_v3, %v1802_v2  ;;  %v1805_v6 = vpop.f32.mrb[74].mxu1 }
 0x2aa   :  { %v1806_v7 = vpop.f32.mrb[75].mxu1 }
 0x2ab   :  { %2055 = vmatmul.mubr.bf16.gmra.mrb[16].mxu0 %v850_v4  ;;  %v763_v8 = vadd.f32 %v1804_v5, %v2484_v51  ;;  %v1807_v9 = vadd.f32 %v1806_v7, %v1805_v6 }
 0x2ad   :  { %v766_v10 = vadd.f32 %v1807_v9, %v2484_v51  ;;  %v829_v12 = vmax.f32 %v763_v8, 0.0 }
 0x2af   :  { %v830_v14 = vmax.f32 %v766_v10, 0.0  ;;  %v1808_v38 = vpop.f32.mrb[76].mxu1 }
 0x2b0   :  { %v1809_v39 = vpop.f32.mrb[77].mxu1 }
 0x2b1   :  { %v1810_v42 = vadd.f32 %v1809_v39, %v1808_v38  ;;  %v1811_v43 = vpop.f32.mrb[78].mxu1  ;;  %v851_v49 = vpack.c.bf16 %v830_v14, %v829_v12 }
 0x2b2   :  { %v1812_v50 = vpop.f32.mrb[79].mxu1 }
 0x2b3   :  { %v771_v52 = vadd.f32 %v1810_v42, %v2484_v51  ;;  %v1813_v53 = vadd.f32 %v1812_v50, %v1811_v43  ;;  %2058 = vmatprep.mubr.bf16.mxu0 %v851_v49 }
 0x2b5   :  { %v774_v54 = vadd.f32 %v1813_v53, %v2484_v51  ;;  %v831_v55 = vmax.f32 %v771_v52, 0.0 }
 0x2b7   :  { %v832_v56 = vmax.f32 %v774_v54, 0.0  ;;  %v1814_v57 = vpop.f32.mrb[80].mxu1 }
 0x2b8   :  { %v1815_v58 = vpop.f32.mrb[81].mxu1 }
 0x2b9   :  { %v852_v59 = vpack.c.bf16 %v832_v56, %v831_v55  ;;  %v1816_v60 = vadd.f32 %v1815_v58, %v1814_v57  ;;  %v1817_v61 = vpop.f32.mrb[82].mxu1 }
 0x2ba   :  { %v1818_v62 = vpop.f32.mrb[83].mxu1 }
 0x2bb   :  { %2059 = vmatmul.mubr.bf16.gmra.mrb[20].mxu0 %v852_v59  ;;  %v779_v63 = vadd.f32 %v1816_v60, %v2484_v51  ;;  %v1819_v0 = vadd.f32 %v1818_v62, %v1817_v61 }
 0x2bd   :  { %v782_v1 = vadd.f32 %v1819_v0, %v2484_v51  ;;  %v833_v2 = vmax.f32 %v779_v63, 0.0 }
 0x2bf   :  { %v834_v3 = vmax.f32 %v782_v1, 0.0  ;;  %v1820_v4 = vpop.f32.mrb[84].mxu1 }
 0x2c0   :  { %v1821_v5 = vpop.f32.mrb[85].mxu1 }
 0x2c1   :  { %v1822_v6 = vadd.f32 %v1821_v5, %v1820_v4  ;;  %v1823_v7 = vpop.f32.mrb[86].mxu1  ;;  %v853_v8 = vpack.c.bf16 %v834_v3, %v833_v2 }
 0x2c2   :  { %v1824_v9 = vpop.f32.mrb[87].mxu1 }
 0x2c3   :  { %v787_v10 = vadd.f32 %v1822_v6, %v2484_v51  ;;  %v1825_v12 = vadd.f32 %v1824_v9, %v1823_v7  ;;  %2062 = vmatprep.mubr.bf16.mxu0 %v853_v8 }
 0x2c5   :  { %v790_v14 = vadd.f32 %v1825_v12, %v2484_v51  ;;  %v835_v38 = vmax.f32 %v787_v10, 0.0 }
 0x2c7   :  { %v836_v39 = vmax.f32 %v790_v14, 0.0  ;;  %v1826_v42 = vpop.f32.mrb[88].mxu1 }
 0x2c8   :  { %v1827_v43 = vpop.f32.mrb[89].mxu1 }
 0x2c9   :  { %v854_v49 = vpack.c.bf16 %v836_v39, %v835_v38  ;;  %v1828_v50 = vadd.f32 %v1827_v43, %v1826_v42  ;;  %v1829_v52 = vpop.f32.mrb[90].mxu1 }
 0x2ca   :  { %v1830_v53 = vpop.f32.mrb[91].mxu1 }
 0x2cb   :  { %2063 = vmatmul.mubr.bf16.gmra.mrb[24].mxu0 %v854_v49  ;;  %v795_v54 = vadd.f32 %v1828_v50, %v2484_v51  ;;  %v1831_v55 = vadd.f32 %v1830_v53, %v1829_v52 }
 0x2cd   :  { %v798_v56 = vadd.f32 %v1831_v55, %v2484_v51  ;;  %v837_v57 = vmax.f32 %v795_v54, 0.0 }
 0x2cf   :  { %v838_v58 = vmax.f32 %v798_v56, 0.0  ;;  %v1832_v59 = vpop.f32.mrb[92].mxu1 }
 0x2d0   :  { %v1833_v60 = vpop.f32.mrb[93].mxu1 }
 0x2d1   :  { %v1834_v61 = vadd.f32 %v1833_v60, %v1832_v59  ;;  %v1835_v62 = vpop.f32.mrb[94].mxu1  ;;  %v855_v63 = vpack.c.bf16 %v838_v58, %v837_v57 }
 0x2d2   :  { %v1836_v0 = vpop.f32.mrb[95].mxu1 }
 0x2d3   :  { %v803_v1 = vadd.f32 %v1834_v61, %v2484_v51  ;;  %v1837_v2 = vadd.f32 %v1836_v0, %v1835_v62  ;;  %2066 = vmatprep.mubr.bf16.mxu0 %v855_v63 }
 0x2d5   :  { %v806_v3 = vadd.f32 %v1837_v2, %v2484_v51  ;;  %v839_v4 = vmax.f32 %v803_v1, 0.0 }
 0x2d7   :  { %v840_v5 = vmax.f32 %v806_v3, 0.0 }
 0x2d9   :  { %v856_v6 = vpack.c.bf16 %v840_v5, %v839_v4 }
 0x2db   :  { %2067 = vmatmul.mubr.bf16.gmra.mrb[28].mxu0 %v856_v6 }
 0x2dc   :  { %1137 = vmatprep.mubr.bf16.mxu0 %v2385_v24 }
 0x33e   :  { %v2040_v7 = vpop.f32.mrb[0].mxu0 }
 0x33f   :  { %v956_v8 = vpop.f32.mrb[1].mxu0 }
 0x340   :  { %v2041_v9 = vpop.f32.mrb[2].mxu0 }
 0x341   :  { %v1084_v10 = vpack.c.bf16 %v2041_v9, %v2040_v7  ;;  %v959_v12 = vpop.f32.mrb[3].mxu0 }
 0x342   :  { %v1083_v14 = vpack.c.bf16 %v959_v12, %v956_v8 }
 0x34e   :  { %v2044_v38 = vpop.f32.mrb[4].mxu0 }
 0x34f   :  { %v972_v39 = vpop.f32.mrb[5].mxu0 }
 0x350   :  { %v2045_v42 = vpop.f32.mrb[6].mxu0 }
 0x351   :  { %v1086_v43 = vpack.c.bf16 %v2045_v42, %v2044_v38  ;;  %v975_v49 = vpop.f32.mrb[7].mxu0 }
 0x352   :  { %v1085_v50 = vpack.c.bf16 %v975_v49, %v972_v39 }
 0x35e   :  { %v2048_v52 = vpop.f32.mrb[8].mxu0 }
 0x35f   :  { %v988_v51 = vpop.f32.mrb[9].mxu0 }
 0x360   :  { %v2049_v53 = vpop.f32.mrb[10].mxu0 }
 0x361   :  { %v1088_v54 = vpack.c.bf16 %v2049_v53, %v2048_v52  ;;  %v991_v55 = vpop.f32.mrb[11].mxu0 }
 0x362   :  { %v1087_v56 = vpack.c.bf16 %v991_v55, %v988_v51 }
 0x36e   :  { %v2052_v57 = vpop.f32.mrb[12].mxu0 }
 0x36f   :  { %v1004_v24 = vpop.f32.mrb[13].mxu0 }
 0x370   :  { %v2053_v58 = vpop.f32.mrb[14].mxu0 }
 0x371   :  { %v1090_v59 = vpack.c.bf16 %v2053_v58, %v2052_v57  ;;  %v1007_v60 = vpop.f32.mrb[15].mxu0 }
 0x372   :  { %v1089_v61 = vpack.c.bf16 %v1007_v60, %v1004_v24 }
 0x37e   :  { %v2056_v62 = vpop.f32.mrb[16].mxu0 }
 0x37f   :  { %v1020_v63 = vpop.f32.mrb[17].mxu0 }
 0x380   :  { %v2057_v0 = vpop.f32.mrb[18].mxu0 }
 0x381   :  { %v1092_v1 = vpack.c.bf16 %v2057_v0, %v2056_v62  ;;  %v1023_v2 = vpop.f32.mrb[19].mxu0 }
 0x382   :  { %v1091_v3 = vpack.c.bf16 %v1023_v2, %v1020_v63 }
 0x384   :  { %1862 = vmatprep.subr.bf16.mxu0 %v1091_v3 }
 0x385   :  { %1863 = vmatpush3.bf16.msra.mxu0 %v1083_v14 }
 0x386   :  { %1864 = vmatprep.subr.bf16.mxu0 %v1092_v1 }
 0x389   :  { %1865 = vmatpush3.bf16.msra.mxu0 %v1084_v10 }
 0x38e   :  { %v2060_v4 = vpop.f32.mrb[20].mxu0 }
 0x38f   :  { %v1036_v5 = vpop.f32.mrb[21].mxu0 }
 0x390   :  { %v2061_v6 = vpop.f32.mrb[22].mxu0 }
 0x391   :  { %v1094_v7 = vpack.c.bf16 %v2061_v6, %v2060_v4  ;;  %v1039_v8 = vpop.f32.mrb[23].mxu0 }
 0x392   :  { %v1093_v9 = vpack.c.bf16 %v1039_v8, %v1036_v5 }
 0x394   :  { %1866 = vmatprep.subr.bf16.mxu0 %v1093_v9 }
 0x395   :  { %1867 = vmatpush3.bf16.msra.mxu0 %v1085_v50 }
 0x396   :  { %1868 = vmatprep.subr.bf16.mxu0 %v1094_v7 }
 0x399   :  { %1869 = vmatpush3.bf16.msra.mxu0 %v1086_v43 }
 0x39e   :  { %v2064_v12 = vpop.f32.mrb[24].mxu0 }
 0x39f   :  { %v1052_v38 = vpop.f32.mrb[25].mxu0 }
 0x3a0   :  { %v2065_v39 = vpop.f32.mrb[26].mxu0 }
 0x3a1   :  { %v1096_v42 = vpack.c.bf16 %v2065_v39, %v2064_v12  ;;  %v1055_v49 = vpop.f32.mrb[27].mxu0 }
 0x3a2   :  { %v1095_v52 = vpack.c.bf16 %v1055_v49, %v1052_v38 }
 0x3a4   :  { %1870 = vmatprep.subr.bf16.mxu0 %v1095_v52 }
 0x3a5   :  { %1871 = vmatpush3.bf16.msra.mxu0 %v1087_v56 }
 0x3a6   :  { %1872 = vmatprep.subr.bf16.mxu0 %v1096_v42 }
 0x3a9   :  { %1873 = vmatpush3.bf16.msra.mxu0 %v1088_v54 }
 0x3ae   :  { %v2068_v10 = vpop.f32.mrb[28].mxu0 }
 0x3af   :  { %v1068_v14 = vpop.f32.mrb[29].mxu0 }
 0x3b0   :  { %v2069_v51 = vpop.f32.mrb[30].mxu0 }
 0x3b1   :  { %v1098_v53 = vpack.c.bf16 %v2069_v51, %v2068_v10  ;;  %v1071_v55 = vpop.f32.mrb[31].mxu0 }
 0x3b2   :  { %v1097_v57 = vpack.c.bf16 %v1071_v55, %v1068_v14 }
 0x3b4   :  { %1874 = vmatprep.subr.bf16.mxu0 %v1097_v57 }
 0x3b5   :  { %1875 = vmatpush3.bf16.msra.mxu0 %v1089_v61 }
 0x3b6   :  { %1876 = vmatprep.subr.bf16.mxu0 %v1098_v53 }
 0x3b9   :  { %1877 = vmatpush3.bf16.msra.mxu0 %v1090_v59 }
 0x3bc   :  { %1138 = vmatmul.mubr.bf16.vlgmr.msra.gmra.mrb[32].mxu0 %v2388_v11 }
 0x3bd   :  { %1145 = vmatprep.mubr.bf16.mxu0 %v2390_v13  ;;  %v2553_v13 = vld [vmem:[%s2607_s5] ss:$0 sm:$0xff]  ;;  %s2285_s5 = smov [#allocation10]  }
 0x3be   :  { %s1463_s25 = sshll.u32 %s2285_s5, 4  ;;  %s1464_s25 = int_to_ptr.vmem [resolvable:$true] %s1463_s25 }
 0x3bf   :  { %s2247_s26 = scalar_lea.vmem %s1464_s25, 2048  ;;  %p2252_p5 = scmp.lt.s32.totalorder %s1464_s25, %s1464_s25 }
 0x3c0   :  { %p2248_p4 = scmp.ne.s32.totalorder %s1464_s25, %s2247_s26  ;;  %p2253_p6 = scmp.lt.s32.totalorder %s2247_s26, %s2247_s26 }
 0x3c2   :  { %p2254_p7 = por %p2253_p6, %p2252_p5 }
 0x3c4   :  { %1146 = vmatmul.mubr.bf16.gmra.mrb[36].mxu0 %v2394_v15  ;;  %p2255_p8 = pnand %p2254_p7, %p2248_p4 }
 0x3c5   :  { %1153 = vmatprep.mubr.bf16.mxu0 %v2396_v16 }
 0x3cc   :  { %1154 = vmatmul.mubr.bf16.gmra.mrb[40].mxu0 %v2400_v17 }
 0x3cd   :  { %1161 = vmatprep.mubr.bf16.mxu0 %v2402_v18 }
 0x3d4   :  { %1162 = vmatmul.mubr.bf16.gmra.mrb[44].mxu0 %v2406_v19 }
 0x3d5   :  { %1169 = vmatprep.mubr.bf16.mxu0 %v2408_v20 }
 0x3dc   :  { %1170 = vmatmul.mubr.bf16.gmra.mrb[48].mxu0 %v2412_v21 }
 0x3dd   :  { %1177 = vmatprep.mubr.bf16.mxu0 %v2414_v22 }
 0x3e4   :  { %1178 = vmatmul.mubr.bf16.gmra.mrb[52].mxu0 %v2418_v23 }
 0x3e5   :  { %1185 = vmatprep.mubr.bf16.mxu0 %v2420_v25 }
 0x3ec   :  { %1186 = vmatmul.mubr.bf16.gmra.mrb[56].mxu0 %v2424_v26 }
 0x3ed   :  { %1193 = vmatprep.mubr.bf16.mxu0 %v2426_v27 }
 0x3f4   :  { %1194 = vmatmul.mubr.bf16.gmra.mrb[60].mxu0 %v2430_v28 }
 0x3f5   :  { %1201 = vmatprep.mubr.bf16.mxu0 %v2432_v29 }
 0x3fc   :  { %1202 = vmatmul.mubr.bf16.gmra.mrb[64].mxu0 %v2436_v30 }
 0x3fd   :  { %1209 = vmatprep.mubr.bf16.mxu0 %v2438_v31 }
 0x404   :  { %1210 = vmatmul.mubr.bf16.gmra.mrb[68].mxu0 %v2442_v32 }
 0x405   :  { %1217 = vmatprep.mubr.bf16.mxu0 %v2444_v33 }
 0x40c   :  { %1218 = vmatmul.mubr.bf16.gmra.mrb[72].mxu0 %v2448_v34 }
 0x40d   :  { %1225 = vmatprep.mubr.bf16.mxu0 %v2450_v35 }
 0x414   :  { %1226 = vmatmul.mubr.bf16.gmra.mrb[76].mxu0 %v2454_v36 }
 0x415   :  { %1233 = vmatprep.mubr.bf16.mxu0 %v2456_v37 }
 0x41c   :  { %1234 = vmatmul.mubr.bf16.gmra.mrb[80].mxu0 %v2460_v40 }
 0x41d   :  { %1241 = vmatprep.mubr.bf16.mxu0 %v2462_v41 }
 0x424   :  { %1242 = vmatmul.mubr.bf16.gmra.mrb[84].mxu0 %v2466_v44 }
 0x425   :  { %1249 = vmatprep.mubr.bf16.mxu0 %v2468_v45 }
 0x42c   :  { %1250 = vmatmul.mubr.bf16.gmra.mrb[88].mxu0 %v2472_v46 }
 0x42d   :  { %1257 = vmatprep.mubr.bf16.mxu0 %v2474_v47 }
 0x434   :  { %1258 = vmatmul.mubr.bf16.gmra.mrb[92].mxu0 %v2478_v48 }
 0x48f   :  { %v1878_v11 = vpop.f32.mrb[32].mxu0 }
 0x490   :  { %v1879_v15 = vpop.f32.mrb[33].mxu0 }
 0x491   :  { %v1880_v16 = vadd.f32 %v1879_v15, %v1878_v11  ;;  %v1881_v17 = vpop.f32.mrb[34].mxu0 }
 0x492   :  { %v1882_v18 = vpop.f32.mrb[35].mxu0 }
 0x493   :  { %v1140_v19 = vadd.f32 %v1880_v16, %v2553_v13  ;;  %v1883_v20 = vadd.f32 %v1882_v18, %v1881_v17 }
 0x495   :  { %v1143_v21 = vadd.f32 %v1883_v20, %v2553_v13  ;;  %v1266_v22 = vmax.f32 %v1140_v19, 0.0 }
 0x497   :  { %v1267_v23 = vmax.f32 %v1143_v21, 0.0  ;;  %v1884_v25 = vpop.f32.mrb[36].mxu0 }
 0x498   :  { %v1885_v26 = vpop.f32.mrb[37].mxu0 }
 0x499   :  { %v1610_v27 = vpack.c.bf16 %v1267_v23, %v1266_v22  ;;  %v1886_v28 = vadd.f32 %v1885_v26, %v1884_v25  ;;  %v1887_v29 = vpop.f32.mrb[38].mxu0 }
 0x49a   :  { %v1888_v30 = vpop.f32.mrb[39].mxu0 }
 0x49b   :  { %1611 = vst [vmem:[#allocation10] sm:$0xff] %v1610_v27   ;;  %v1148_v31 = vadd.f32 %v1886_v28, %v2553_v13  ;;  %v1889_v32 = vadd.f32 %v1888_v30, %v1887_v29 }
 0x49d   :  { %v1151_v33 = vadd.f32 %v1889_v32, %v2553_v13  ;;  %v1268_v34 = vmax.f32 %v1148_v31, 0.0 }
 0x49f   :  { %v1269_v35 = vmax.f32 %v1151_v33, 0.0  ;;  %v1890_v36 = vpop.f32.mrb[40].mxu0 }
 0x4a0   :  { %v1891_v37 = vpop.f32.mrb[41].mxu0 }
 0x4a1   :  { %v1615_v40 = vpack.c.bf16 %v1269_v35, %v1268_v34  ;;  %v1892_v41 = vadd.f32 %v1891_v37, %v1890_v36  ;;  %v1893_v44 = vpop.f32.mrb[42].mxu0 }
 0x4a2   :  { %v1894_v45 = vpop.f32.mrb[43].mxu0 }
 0x4a3   :  { %1687 = vst [vmem:[#allocation10 + $0x8] sm:$0xff] %v1615_v40   ;;  %v1156_v46 = vadd.f32 %v1892_v41, %v2553_v13  ;;  %v1895_v47 = vadd.f32 %v1894_v45, %v1893_v44 }
 0x4a5   :  { %v1159_v48 = vadd.f32 %v1895_v47, %v2553_v13  ;;  %v1270_v43 = vmax.f32 %v1156_v46, 0.0 }
 0x4a7   :  { %v1271_v50 = vmax.f32 %v1159_v48, 0.0  ;;  %v1896_v54 = vpop.f32.mrb[44].mxu0 }
 0x4a8   :  { %v1897_v56 = vpop.f32.mrb[45].mxu0 }
 0x4a9   :  { %v1620_v24 = vpack.c.bf16 %v1271_v50, %v1270_v43  ;;  %v1898_v58 = vadd.f32 %v1897_v56, %v1896_v54  ;;  %v1899_v59 = vpop.f32.mrb[46].mxu0 }
 0x4aa   :  { %v1900_v60 = vpop.f32.mrb[47].mxu0 }
 0x4ab   :  { %1688 = vst [vmem:[#allocation10 + $0x10] sm:$0xff] %v1620_v24   ;;  %v1164_v61 = vadd.f32 %v1898_v58, %v2553_v13  ;;  %v1901_v62 = vadd.f32 %v1900_v60, %v1899_v59 }
 0x4ad   :  { %v1167_v63 = vadd.f32 %v1901_v62, %v2553_v13  ;;  %v1272_v0 = vmax.f32 %v1164_v61, 0.0 }
 0x4af   :  { %v1273_v1 = vmax.f32 %v1167_v63, 0.0  ;;  %v1902_v2 = vpop.f32.mrb[48].mxu0 }
 0x4b0   :  { %v1903_v3 = vpop.f32.mrb[49].mxu0 }
 0x4b1   :  { %v1625_v4 = vpack.c.bf16 %v1273_v1, %v1272_v0  ;;  %v1904_v5 = vadd.f32 %v1903_v3, %v1902_v2  ;;  %v1905_v6 = vpop.f32.mrb[50].mxu0 }
 0x4b2   :  { %v1906_v7 = vpop.f32.mrb[51].mxu0 }
 0x4b3   :  { %1689 = vst [vmem:[#allocation10 + $0x18] sm:$0xff] %v1625_v4   ;;  %v1172_v8 = vadd.f32 %v1904_v5, %v2553_v13  ;;  %v1907_v9 = vadd.f32 %v1906_v7, %v1905_v6 }
 0x4b5   :  { %v1175_v12 = vadd.f32 %v1907_v9, %v2553_v13  ;;  %v1274_v38 = vmax.f32 %v1172_v8, 0.0 }
 0x4b7   :  { %v1275_v39 = vmax.f32 %v1175_v12, 0.0  ;;  %v1908_v42 = vpop.f32.mrb[52].mxu0 }
 0x4b8   :  { %v1909_v49 = vpop.f32.mrb[53].mxu0 }
 0x4b9   :  { %v1630_v52 = vpack.c.bf16 %v1275_v39, %v1274_v38  ;;  %v1910_v10 = vadd.f32 %v1909_v49, %v1908_v42  ;;  %v1911_v14 = vpop.f32.mrb[54].mxu0 }
 0x4ba   :  { %v1912_v51 = vpop.f32.mrb[55].mxu0 }
 0x4bb   :  { %1690 = vst [vmem:[#allocation10 + $0x20] sm:$0xff] %v1630_v52   ;;  %v1180_v53 = vadd.f32 %v1910_v10, %v2553_v13  ;;  %v1913_v55 = vadd.f32 %v1912_v51, %v1911_v14 }
 0x4bd   :  { %v1183_v57 = vadd.f32 %v1913_v55, %v2553_v13  ;;  %v1276_v11 = vmax.f32 %v1180_v53, 0.0 }
 0x4bf   :  { %v1277_v15 = vmax.f32 %v1183_v57, 0.0  ;;  %v1914_v16 = vpop.f32.mrb[56].mxu0 }
 0x4c0   :  { %v1915_v17 = vpop.f32.mrb[57].mxu0 }
 0x4c1   :  { %v1635_v18 = vpack.c.bf16 %v1277_v15, %v1276_v11  ;;  %v1916_v19 = vadd.f32 %v1915_v17, %v1914_v16  ;;  %v1917_v20 = vpop.f32.mrb[58].mxu0 }
 0x4c2   :  { %v1918_v21 = vpop.f32.mrb[59].mxu0 }
 0x4c3   :  { %1691 = vst [vmem:[#allocation10 + $0x28] sm:$0xff] %v1635_v18   ;;  %v1188_v22 = vadd.f32 %v1916_v19, %v2553_v13  ;;  %v1919_v23 = vadd.f32 %v1918_v21, %v1917_v20 }
 0x4c5   :  { %v1191_v25 = vadd.f32 %v1919_v23, %v2553_v13  ;;  %v1278_v26 = vmax.f32 %v1188_v22, 0.0 }
 0x4c7   :  { %v1279_v27 = vmax.f32 %v1191_v25, 0.0  ;;  %v1920_v28 = vpop.f32.mrb[60].mxu0 }
 0x4c8   :  { %v1921_v29 = vpop.f32.mrb[61].mxu0 }
 0x4c9   :  { %v1640_v30 = vpack.c.bf16 %v1279_v27, %v1278_v26  ;;  %v1922_v31 = vadd.f32 %v1921_v29, %v1920_v28  ;;  %v1923_v32 = vpop.f32.mrb[62].mxu0 }
 0x4ca   :  { %v1924_v33 = vpop.f32.mrb[63].mxu0 }
 0x4cb   :  { %1692 = vst [vmem:[#allocation10 + $0x30] sm:$0xff] %v1640_v30   ;;  %v1196_v34 = vadd.f32 %v1922_v31, %v2553_v13  ;;  %v1925_v35 = vadd.f32 %v1924_v33, %v1923_v32 }
 0x4cd   :  { %v1199_v36 = vadd.f32 %v1925_v35, %v2553_v13  ;;  %v1280_v37 = vmax.f32 %v1196_v34, 0.0 }
 0x4cf   :  { %v1281_v40 = vmax.f32 %v1199_v36, 0.0  ;;  %v1926_v41 = vpop.f32.mrb[64].mxu0 }
 0x4d0   :  { %v1927_v44 = vpop.f32.mrb[65].mxu0 }
 0x4d1   :  { %v1645_v45 = vpack.c.bf16 %v1281_v40, %v1280_v37  ;;  %v1928_v46 = vadd.f32 %v1927_v44, %v1926_v41  ;;  %v1929_v47 = vpop.f32.mrb[66].mxu0 }
 0x4d2   :  { %v1930_v48 = vpop.f32.mrb[67].mxu0 }
 0x4d3   :  { %1693 = vst [vmem:[#allocation10 + $0x38] sm:$0xff] %v1645_v45   ;;  %v1204_v43 = vadd.f32 %v1928_v46, %v2553_v13  ;;  %v1931_v50 = vadd.f32 %v1930_v48, %v1929_v47 }
 0x4d5   :  { %v1207_v54 = vadd.f32 %v1931_v50, %v2553_v13  ;;  %v1282_v56 = vmax.f32 %v1204_v43, 0.0 }
 0x4d7   :  { %v1283_v24 = vmax.f32 %v1207_v54, 0.0  ;;  %v1932_v58 = vpop.f32.mrb[68].mxu0 }
 0x4d8   :  { %v1933_v59 = vpop.f32.mrb[69].mxu0 }
 0x4d9   :  { %v1650_v60 = vpack.c.bf16 %v1283_v24, %v1282_v56  ;;  %v1934_v61 = vadd.f32 %v1933_v59, %v1932_v58  ;;  %v1935_v62 = vpop.f32.mrb[70].mxu0 }
 0x4da   :  { %v1936_v63 = vpop.f32.mrb[71].mxu0 }
 0x4db   :  { %1694 = vst [vmem:[#allocation10 + $0x40] sm:$0xff] %v1650_v60   ;;  %v1212_v0 = vadd.f32 %v1934_v61, %v2553_v13  ;;  %v1937_v1 = vadd.f32 %v1936_v63, %v1935_v62 }
 0x4dd   :  { %v1215_v2 = vadd.f32 %v1937_v1, %v2553_v13  ;;  %v1284_v3 = vmax.f32 %v1212_v0, 0.0 }
 0x4df   :  { %v1285_v4 = vmax.f32 %v1215_v2, 0.0  ;;  %v1938_v5 = vpop.f32.mrb[72].mxu0 }
 0x4e0   :  { %v1939_v6 = vpop.f32.mrb[73].mxu0 }
 0x4e1   :  { %v1655_v7 = vpack.c.bf16 %v1285_v4, %v1284_v3  ;;  %v1940_v8 = vadd.f32 %v1939_v6, %v1938_v5  ;;  %v1941_v9 = vpop.f32.mrb[74].mxu0 }
 0x4e2   :  { %v1942_v12 = vpop.f32.mrb[75].mxu0 }
 0x4e3   :  { %1695 = vst [vmem:[#allocation10 + $0x48] sm:$0xff] %v1655_v7   ;;  %v1220_v38 = vadd.f32 %v1940_v8, %v2553_v13  ;;  %v1943_v39 = vadd.f32 %v1942_v12, %v1941_v9 }
 0x4e5   :  { %v1223_v42 = vadd.f32 %v1943_v39, %v2553_v13  ;;  %v1286_v49 = vmax.f32 %v1220_v38, 0.0 }
 0x4e7   :  { %v1287_v52 = vmax.f32 %v1223_v42, 0.0  ;;  %v1944_v10 = vpop.f32.mrb[76].mxu0 }
 0x4e8   :  { %v1945_v14 = vpop.f32.mrb[77].mxu0 }
 0x4e9   :  { %v1660_v51 = vpack.c.bf16 %v1287_v52, %v1286_v49  ;;  %v1946_v53 = vadd.f32 %v1945_v14, %v1944_v10  ;;  %v1947_v55 = vpop.f32.mrb[78].mxu0 }
 0x4ea   :  { %v1948_v57 = vpop.f32.mrb[79].mxu0 }
 0x4eb   :  { %1696 = vst [vmem:[#allocation10 + $0x50] sm:$0xff] %v1660_v51   ;;  %v1228_v11 = vadd.f32 %v1946_v53, %v2553_v13  ;;  %v1949_v15 = vadd.f32 %v1948_v57, %v1947_v55 }
 0x4ed   :  { %v1231_v16 = vadd.f32 %v1949_v15, %v2553_v13  ;;  %v1288_v17 = vmax.f32 %v1228_v11, 0.0 }
 0x4ef   :  { %v1289_v18 = vmax.f32 %v1231_v16, 0.0  ;;  %v1950_v19 = vpop.f32.mrb[80].mxu0 }
 0x4f0   :  { %v1951_v20 = vpop.f32.mrb[81].mxu0 }
 0x4f1   :  { %v1665_v21 = vpack.c.bf16 %v1289_v18, %v1288_v17  ;;  %v1952_v22 = vadd.f32 %v1951_v20, %v1950_v19  ;;  %v1953_v23 = vpop.f32.mrb[82].mxu0 }
 0x4f2   :  { %v1954_v25 = vpop.f32.mrb[83].mxu0 }
 0x4f3   :  { %1697 = vst [vmem:[#allocation10 + $0x58] sm:$0xff] %v1665_v21   ;;  %v1236_v26 = vadd.f32 %v1952_v22, %v2553_v13  ;;  %v1955_v27 = vadd.f32 %v1954_v25, %v1953_v23 }
 0x4f5   :  { %v1239_v28 = vadd.f32 %v1955_v27, %v2553_v13  ;;  %v1290_v29 = vmax.f32 %v1236_v26, 0.0 }
 0x4f7   :  { %v1291_v30 = vmax.f32 %v1239_v28, 0.0  ;;  %v1956_v31 = vpop.f32.mrb[84].mxu0 }
 0x4f8   :  { %v1957_v32 = vpop.f32.mrb[85].mxu0 }
 0x4f9   :  { %v1670_v33 = vpack.c.bf16 %v1291_v30, %v1290_v29  ;;  %v1958_v34 = vadd.f32 %v1957_v32, %v1956_v31  ;;  %v1959_v35 = vpop.f32.mrb[86].mxu0 }
 0x4fa   :  { %v1960_v36 = vpop.f32.mrb[87].mxu0 }
 0x4fb   :  { %1698 = vst [vmem:[#allocation10 + $0x60] sm:$0xff] %v1670_v33   ;;  %v1244_v37 = vadd.f32 %v1958_v34, %v2553_v13  ;;  %v1961_v40 = vadd.f32 %v1960_v36, %v1959_v35 }
 0x4fd   :  { %v1247_v41 = vadd.f32 %v1961_v40, %v2553_v13  ;;  %v1292_v44 = vmax.f32 %v1244_v37, 0.0 }
 0x4ff   :  { %v1293_v45 = vmax.f32 %v1247_v41, 0.0  ;;  %v1962_v46 = vpop.f32.mrb[88].mxu0 }
 0x500   :  { %v1963_v47 = vpop.f32.mrb[89].mxu0 }
 0x501   :  { %v1675_v48 = vpack.c.bf16 %v1293_v45, %v1292_v44  ;;  %v1964_v43 = vadd.f32 %v1963_v47, %v1962_v46  ;;  %v1965_v50 = vpop.f32.mrb[90].mxu0 }
 0x502   :  { %v1966_v54 = vpop.f32.mrb[91].mxu0 }
 0x503   :  { %1699 = vst [vmem:[#allocation10 + $0x68] sm:$0xff] %v1675_v48   ;;  %v1252_v56 = vadd.f32 %v1964_v43, %v2553_v13  ;;  %v1967_v24 = vadd.f32 %v1966_v54, %v1965_v50 }
 0x505   :  { %v1255_v58 = vadd.f32 %v1967_v24, %v2553_v13  ;;  %v1294_v59 = vmax.f32 %v1252_v56, 0.0 }
 0x507   :  { %v1295_v60 = vmax.f32 %v1255_v58, 0.0  ;;  %v1968_v61 = vpop.f32.mrb[92].mxu0 }
 0x508   :  { %v1969_v62 = vpop.f32.mrb[93].mxu0 }
 0x509   :  { %v1680_v63 = vpack.c.bf16 %v1295_v60, %v1294_v59  ;;  %v1970_v0 = vadd.f32 %v1969_v62, %v1968_v61  ;;  %v1971_v1 = vpop.f32.mrb[94].mxu0 }
 0x50a   :  { %v1972_v2 = vpop.f32.mrb[95].mxu0 }
 0x50b   :  { %1700 = vst [vmem:[#allocation10 + $0x70] sm:$0xff] %v1680_v63   ;;  %v1260_v3 = vadd.f32 %v1970_v0, %v2553_v13  ;;  %v1973_v4 = vadd.f32 %v1972_v2, %v1971_v1 }
 0x50d   :  { %v1263_v5 = vadd.f32 %v1973_v4, %v2553_v13  ;;  %v1296_v6 = vmax.f32 %v1260_v3, 0.0 }
 0x50f   :  { %v1297_v7 = vmax.f32 %v1263_v5, 0.0 }
 0x511   :  { %v1685_v8 = vpack.c.bf16 %v1297_v7, %v1296_v6 }
 0x513   :  { %1701 = vst [vmem:[#allocation10 + $0x78] sm:$0xff] %v1685_v8  }
 0x514   :  { %2258 = shalt.err (!%p2255_p8)
}
 0x515   :  { %s2259_s29 = scalar_lea.hbm %s2608_s6, 2048 }
 0x516   :  { %p2260_p9 = scmp.ne.s32.totalorder %s2608_s6, %s2259_s29  ;;  %p2263_p10 = scmp.lt.u32.totalorder %s2259_s29, %s2608_s6 }
 0x518   :  { %p2265_p11 = pnand %p2263_p10, %p2260_p9 }
 0x51a   :  { %2268 = shalt.err (!%p2265_p11)
}
 0x51b   :  { %1469 = dma.vmem_to_hbm [thread:$0]  %s1464_s25, 2048, %s2608_s6, [#allocation4], %s2278_s7, %s2278_s7, %s2279_s8  }
 0x51c   :  { %2275 = dma.done.wait [#allocation4], 2048  }
 0x51d   :  { %2276 = vsyncadd [#allocation4], 4294965248 }
 0x51e   :  { %1473 = vsyncpa [#allocation3], 1 }
 0x51f   :  { %1474 = vsyncpa [#allocation6], 1 }
 0x520   :  { %1475 = vsyncpa [#allocation9], 1 }
 0x521   :  { %1476 = vsyncpa [#allocation4], 1 }

</bundles_post_ra>
